<compile_context>
chip_gen: v6e
topology: v6e:2x2x1
jax: 0.10.0
libtpu: 0.0.40
codegen_flags: <defaults>
</compile_context>

<pallas_src>
import functools
import numpy as np
import jax
import jax.numpy as jnp
from jax.experimental import pallas as pl
from jax.experimental.pallas import tpu as pltpu


def _copy_kernel(x_ref, o_ref):
    # The "compute" of a view op is just moving the bytes through VMEM.
    o_ref[...] = x_ref[...]


@functools.partial(
    jax.jit, static_argnames=("shape", "target_block_bytes", "donate_input")
)
def _view_forward_impl(x, *, shape, target_block_bytes, donate_input):
    batch = x.shape[:-1]
    D = int(x.shape[-1])
    if int(np.prod(shape)) != D:
        raise ValueError("View shape must match the last dim of the input")

    total = int(np.prod(x.shape))
    if total == 0:
        # Nothing to copy; metadata-only reshape.
        return x.reshape(*batch, *shape)

    itemsize = jnp.dtype(x.dtype).itemsize
    # Sublane packing: 8 for 4-byte, 16 for 2-byte, 32 for 1-byte dtypes.
    pack = max(8, 32 // itemsize)

    # Lane-dense re-view of the flat buffer: pick the widest lane count
    # (multiple of 128) that divides the total element count.
    lane = None
    for cand in (4096, 2048, 1024, 512, 384, 256, 128):
        if total % cand == 0:
            lane = cand
            break
    if lane is not None:
        rows = total // lane
    else:
        # Fallback: logical (rows, last-dim); the lane dim equals the full
        # array extent so the (8, 128) rule is still satisfied.
        lane = D
        rows = total // D

    x2 = x.reshape(rows, lane)

    # Row tile: multiple of the sublane packing, sized for ~target_block_bytes
    # per block, capped at the full row extent.
    rt = max(pack, (target_block_bytes // max(1, lane * itemsize)) // pack * pack)
    rt = int(min(rt, rows))

    block_bytes = rt * lane * itemsize
    # Double-buffered input + output tiles plus headroom; clamp so it is
    # valid on v7x's 64 MiB physical VMEM and never below the default scope.
    vmem_limit = int(min(64 << 20, max(32 << 20, 4 * block_bytes + (4 << 20))))

    grid = (pl.cdiv(rows, rt),)

    kwargs = {}
    if donate_input:
        # Output reuses the input HBM buffer (input is donated by caller).
        kwargs["input_output_aliases"] = {0: 0}

    out2 = pl.pallas_call(
        _copy_kernel,
        out_shape=jax.ShapeDtypeStruct((rows, lane), x.dtype),
        grid=grid,
        in_specs=[pl.BlockSpec((rt, lane), lambda i: (i, 0))],
        out_specs=pl.BlockSpec((rt, lane), lambda i: (i, 0)),
        compiler_params=pltpu.CompilerParams(
            dimension_semantics=("parallel",),
            vmem_limit_bytes=vmem_limit,
        ),
        cost_estimate=pl.CostEstimate(
            flops=0,
            transcendentals=0,
            bytes_accessed=2 * total * itemsize,
        ),
        **kwargs,
    )(x2)

    return out2.reshape(*batch, *shape)


def view_forward(x, shape, *, target_block_bytes=4 << 20, donate_input=False):
    """Pallas implementation of View(shape).forward(x).

    x: array of shape (*batch, D) with D == prod(shape)
    returns: array of shape (*batch, *shape)
    """
    return _view_forward_impl(
        x,
        shape=tuple(int(s) for s in shape),
        target_block_bytes=int(target_block_bytes),
        donate_input=bool(donate_input),
    )


if __name__ == "__main__":
    key = jax.random.PRNGKey(0)

    # --- Test 1: lane-dense path. input (2, 4, 32), View shape = (8, 4) ---
    view_shape = (8, 4)
    x = jax.random.normal(key, (2, 4, 32), dtype=jnp.float32)
    out = jax.block_until_ready(view_forward(x, view_shape))
    ref = x.reshape(*x.shape[:-1], *view_shape)
    assert out.shape == (2, 4, 8, 4), out.shape
    assert out.dtype == x.dtype
    np.testing.assert_array_equal(np.asarray(out), np.asarray(ref))

    # --- Test 2: fallback path (total not divisible by 128) ---
    key2 = jax.random.PRNGKey(0)
    view_shape2 = (3, 4)
    x2 = jax.random.normal(key2, (3, 5, 12), dtype=jnp.float32)
    out2 = jax.block_until_ready(view_forward(x2, view_shape2))
    ref2 = x2.reshape(*x2.shape[:-1], *view_shape2)
    assert out2.shape == (3, 5, 3, 4), out2.shape
    np.testing.assert_array_equal(np.asarray(out2), np.asarray(ref2))

    # --- Test 3: bf16 (sublane packing 16) + 3-way view shape ---
    key3 = jax.random.PRNGKey(0)
    view_shape3 = (2, 4, 4)
    x3 = jax.random.normal(key3, (8, 64, 32), dtype=jnp.bfloat16)
    out3 = jax.block_until_ready(view_forward(x3, view_shape3))
    ref3 = x3.reshape(*x3.shape[:-1], *view_shape3)
    assert out3.shape == (8, 64, 2, 4, 4), out3.shape
    assert out3.dtype == x3.dtype
    np.testing.assert_array_equal(np.asarray(out3), np.asarray(ref3))

    print("KERNEL_OK")
</pallas_src>

<mosaic_0001>
module attributes {stable_mosaic.version = 11 : i64} {
  func.func @_copy_kernel(%arg0: i32, %arg1: memref<1x256xf32, #tpu.memory_space<vmem>>, %arg2: memref<1x256xf32, #tpu.memory_space<vmem>>) attributes {dimension_semantics = [#tpu.dimension_semantics<parallel>], iteration_bounds = array<i64: 1>, scalar_prefetch = 0 : i64, scratch_operands = 0 : i64, tpu.core_type = #tpu.core_type<tc>, window_params = [{transform_indices = @transform_0, window_bounds = array<i64: 1, 256>}, {transform_indices = @transform_1, window_bounds = array<i64: 1, 256>}]} {
    %c0 = arith.constant 0 : index
    %c0_0 = arith.constant 0 : index
    %0 = vector.load %arg1[%c0, %c0_0] : memref<1x256xf32, #tpu.memory_space<vmem>>, vector<1x256xf32>
    %c0_1 = arith.constant 0 : index
    %c0_2 = arith.constant 0 : index
    %1 = vector.load %arg2[%c0_1, %c0_2] : memref<1x256xf32, #tpu.memory_space<vmem>>, vector<1x256xf32>
    tpu.vector_store %arg2[%c0_1, %c0_2], %0 {strides = array<i32>} : memref<1x256xf32, #tpu.memory_space<vmem>>, vector<1x256xf32>,
    return
  }
  func.func @transform_0(%arg0: i32) -> (i32, i32) {
    %c0_i32 = arith.constant 0 : i32
    %c0_i32_0 = arith.constant 0 : i32
    return %arg0, %c0_i32 : i32, i32
  }
  func.func @transform_1(%arg0: i32) -> (i32, i32) {
    %c0_i32 = arith.constant 0 : i32
    %c0_i32_0 = arith.constant 0 : i32
    return %arg0, %c0_i32 : i32, i32
  }
}

</mosaic_0001>

<bundles_post_ra>
// kernel: _view_forward_impl.1
= control target key start
LH: loop header
LB: loop body
LE: loop exit
PB: predicated region body
PF: predicated region fallthrough
CT: control target
= control target key end

     0   :  { %v9_v0 = vlaneseq  ;;  %s34_s0 = inlined_call_operand.vmem [shape: f32[1,256], index: 0, kind: input, shape index: {}]   ;;  %s35_s1 = inlined_call_operand.vmem [shape: f32[1,256], index: 1, kind: output, shape index: {}]  }
   0x1   :  { %v8_v1 = vld [vmem:[%s34_s0] sm:$0x3] }
   0x2   :  { %vm11_vm0 = vcmp.lt.s32.totalorder %v9_v0, 256 }
   0x3   :  { %13 = vst.msk [vmem:[%s35_s1] sm:$0x3] %vm11_vm0, %v8_v1 }

</bundles_post_ra>
